<compile_context>
chip_gen: v5e
topology: v5e:2x2
jax: 0.10.0
libtpu: 0.0.40
codegen_flags: <defaults>
</compile_context>

<pallas_src>
import numpy as np
import jax
import jax.numpy as jnp
from jax import lax
from jax.experimental import pallas as pl
from jax.experimental.pallas import tpu as pltpu


# ---------------------------------------------------------------------------
# Adaptive-avg-pool expressed as a (H*W, size*size) matrix (matches
# torch.nn.AdaptiveAvgPool2d region boundaries: start=floor(i*H/s),
# end=ceil((i+1)*H/s)).
# ---------------------------------------------------------------------------
def adaptive_pool_matrix_T(h, w, size):
    M = np.zeros((h * w, size * size), dtype=np.float32)
    for oi in range(size):
        hs, he = (oi * h) // size, -((-(oi + 1) * h) // size)
        for oj in range(size):
            ws, we = (oj * w) // size, -((-(oj + 1) * w) // size)
            cnt = float((he - hs) * (we - ws))
            for r in range(hs, he):
                for c in range(ws, we):
                    M[r * w + c, oi * size + oj] = 1.0 / cnt
    return M


def psp_matrix_T(h, w, sizes):
    # PSPModule concatenates the flattened pools along the last dim.
    return np.concatenate([adaptive_pool_matrix_T(h, w, s) for s in sizes], axis=1)


# ---------------------------------------------------------------------------
# Device-aware tiling helpers.
# ---------------------------------------------------------------------------
def _single_tensorcore_chip():
    # v5e / v6e have one TensorCore per chip -> grid steps are strictly serial,
    # so there is no benefit in keeping >= 2 of them.  Default to False (the
    # multi-core-safe choice) if the device kind cannot be determined.
    try:
        kind = jax.devices()[0].device_kind.lower()
    except Exception:
        return False
    return any(t in kind for t in ("v5 lite", "v5e", "v5litepod", "v6 lite", "v6e"))


def _vmem_limit_bytes():
    # Explicit scoped-VMEM limit (do not rely on the silent 16/32 MiB default),
    # clamped to a fraction of physical VMEM so it stays valid on 64 MiB v7x.
    try:
        cap = int(pltpu.get_tpu_info().vmem_capacity_bytes)
        return int(min(48 * 1024 * 1024, 0.75 * cap))
    except Exception:
        return None


def _step_vmem_bytes(Ctot, Ck, Co, L, Bt):
    # Double-buffered X / out blocks + in-kernel f32 y slab + its bf16 copies
    # + stage-4 temporaries; resident constants are negligible at these sizes.
    x_blk = 2 * (Ctot + 1) * Bt * L * 2          # bf16 input block, 2 buffers
    o_blk = 2 * Co * Bt * L * 4                  # f32 output block, 2 buffers
    y = 5 * Ck * Bt * L * 4 + 5 * Ck * Bt * L * 2
    tmp = (3 * 20 * L + Co * L) * 4              # S4 / exp / P4 / out_b
    return x_blk + o_blk + y + tmp


def _pick_bt(B, L, Ctot, Ck, Co, max_bt=8, step_vmem_budget=20 << 20):
    # Batch elements per grid step: amortize the ~0.35us/step overhead; keep
    # >= 2 steps only on multi-TensorCore chips (v7x) so both cores get work;
    # cap by a conservative per-step VMEM estimate (v7x has only 64 MiB VMEM).
    cap = min(max_bt, B)
    if B >= 2 and not _single_tensorcore_chip():
        cap = min(cap, max(B // 2, 1))
    while cap > 1 and _step_vmem_bytes(Ctot, Ck, Co, L, cap) > step_vmem_budget:
        cap -= 1
    # Bt must divide B and keep the per-step block lane-aligned (or be B).
    valid = [d for d in range(1, B + 1)
             if B % d == 0 and (d == B or (d * L) % 128 == 0)]
    fitting = [d for d in valid if d <= cap]
    return max(fitting) if fitting else max(valid)


# ---------------------------------------------------------------------------
# Pallas kernel: one grid step == Bt batch elements.
# ---------------------------------------------------------------------------
def build_mqa_kernel(Ck, Co, L, Bt, scale):
    f32 = jnp.float32
    bf16 = jnp.bfloat16
    T_RHS = (((1,), (1,)), ((), ()))      # A @ B^T : contract minor dim of both

    def softmax_last(s):
        # Exact divide: operands are tiny (<= 20x20), keeps parity tight.
        s = s - jnp.max(s, axis=-1, keepdims=True)
        e = jnp.exp(s)
        return e / jnp.sum(e, axis=-1, keepdims=True)

    def kernel(x_ref, wbd_ref, pcat_ref, ww_ref, bw_ref, out_ref):
        # (a) fused block-diagonal 1x1 conv + folded BN bias + ReLU for all five
        #     branches and all Bt batch elements in ONE bf16 MXU matmul.  The
        #     bias rides the ones-row appended to X (last column of Wbd).
        y = jnp.dot(wbd_ref[...], x_ref[...], preferred_element_type=f32)
        y = jnp.maximum(y, 0.0)                              # (5*Ck, Bt*L) f32
        y_pool = y[0:4 * Ck].astype(bf16)                    # key|value|q2|q3
        q4 = y[4 * Ck:5 * Ck].astype(bf16)                   # f_query04

        pcat_t = pcat_ref[...]                               # (35, L) bf16
        ww, bw = ww_ref[...], bw_ref[...]                    # (Co,Ck), (Co,1) f32

        for b in range(Bt):                                  # small static unroll
            lo = b * L

            # (b) ONE M=4*Ck contraction over L for all four pooling branches,
            #     produced token-major directly (no in-kernel transpose).
            pooledT = lax.dot_general(pcat_t, y_pool[:, lo:lo + L], T_RHS,
                                      preferred_element_type=f32)   # (35, 4*Ck)
            K1 = pooledT[0:10, 0 * Ck:1 * Ck]   # f_key == f_query, psp01 (10,Ck)
            V1 = pooledT[0:10, 1 * Ck:2 * Ck]   # f_value,          psp01 (10,Ck)
            Q2 = pooledT[10:15, 2 * Ck:3 * Ck]  # f_query02,        psp02 (5, Ck)
            Q3 = pooledT[15:35, 3 * Ck:4 * Ck]  # f_query03,        psp03 (20,Ck)

            # ---- stage 1: A1 = softmax(scale * Q1 K1^T);  QKV1 = A1 V1
            A1 = softmax_last(scale * lax.dot_general(
                K1, K1, T_RHS, preferred_element_type=f32))          # (10, 10)
            QKV1 = jnp.dot(A1, V1, preferred_element_type=f32)       # (10, Ck)

            # ---- stage 2
            A2 = softmax_last(scale * lax.dot_general(
                Q2, QKV1, T_RHS, preferred_element_type=f32))        # (5, 10)
            QKV2 = jnp.dot(A2, QKV1, preferred_element_type=f32)     # (5, Ck)

            # ---- stage 3
            A3 = softmax_last(scale * lax.dot_general(
                Q3, QKV2, T_RHS, preferred_element_type=f32))        # (20, 5)
            QKV3 = jnp.dot(A3, QKV2, preferred_element_type=f32)     # (20, Ck)

            # ---- stage 4: L stays on lanes; the output 1x1 conv is folded in:
            #      out = ww @ (QKV3^T @ P4) + bw = (ww @ QKV3^T) @ P4 + bw
            S4 = jnp.dot((QKV3 * scale).astype(bf16), q4[:, lo:lo + L],
                         preferred_element_type=f32)                  # (20, L)
            e4 = jnp.exp(S4 - jnp.max(S4, axis=0, keepdims=True))
            P4 = e4 * pl.reciprocal(jnp.sum(e4, axis=0, keepdims=True),
                                    approx=True)                      # (20, L)
            Wq = lax.dot_general(ww, QKV3, T_RHS,
                                 preferred_element_type=f32)          # (Co, 20)
            out_b = jnp.dot(Wq.astype(bf16), P4.astype(bf16),
                            preferred_element_type=f32) + bw          # (Co, L)
            out_ref[:, lo:lo + L] = out_b.astype(out_ref.dtype)

    return kernel


def multi_query_attention_pallas(x1, x2, x3, x4, params, key_channels,
                                 max_bt=8, out_dtype=jnp.float32):
    B, C1, H, W = x1.shape
    C2, C3, C4 = x2.shape[1], x3.shape[1], x4.shape[1]
    # TODO(synk): the fused block-diagonal conv + shared pooling matrix assume
    # all four inputs share the same spatial size (true for the intended usage
    # and this demo); unequal sizes would need per-input conv / pooling passes.
    assert x2.shape[2:] == (H, W) and x3.shape[2:] == (H, W) and x4.shape[2:] == (H, W)
    L = H * W
    Ck = params["wk"].shape[0]
    assert params["wv"].shape[0] == Ck   # module requires value_ch == key_ch
    Co = params["ww"].shape[0]
    Ctot = C1 + C2 + C3 + C4
    scale = float(key_channels) ** (-0.5)
    Bt = _pick_bt(B, L, Ctot, Ck, Co, max_bt=max_bt)

    # ---- host-side packing (layout plumbing, outside the hot loop) ----------
    # activations: NCHW -> (C, B*L) lane-dense slab + ones-row (bias carrier).
    def flat(x):
        return jnp.transpose(x, (1, 0, 2, 3)).reshape(x.shape[1], B * L)

    X = jnp.concatenate([flat(x1), flat(x2), flat(x3), flat(x4),
                         jnp.ones((1, B * L), jnp.float32)],
                        axis=0).astype(jnp.bfloat16)          # (Ctot+1, B*L)

    # block-diagonal fused conv weight; folded BN bias in the last column.
    Wbd = jnp.zeros((5 * Ck, Ctot + 1), jnp.float32)
    Wbd = Wbd.at[0 * Ck:1 * Ck, 0:C1].set(params["wk"])
    Wbd = Wbd.at[1 * Ck:2 * Ck, 0:C1].set(params["wv"])
    Wbd = Wbd.at[2 * Ck:3 * Ck, C1:C1 + C2].set(params["wq2"])
    Wbd = Wbd.at[3 * Ck:4 * Ck, C1 + C2:C1 + C2 + C3].set(params["wq3"])
    Wbd = Wbd.at[4 * Ck:5 * Ck, C1 + C2 + C3:Ctot].set(params["wq4"])
    bias = jnp.concatenate([params["bk"], params["bv"], params["bq2"],
                            params["bq3"], params["bq4"]], axis=0)   # (5*Ck, 1)
    Wbd = Wbd.at[:, Ctot:Ctot + 1].set(bias).astype(jnp.bfloat16)

    # single fused pooling matrix psp01|psp02|psp03, stored token-major (35, L).
    PcatT = jnp.asarray(np.concatenate(
        [psp_matrix_T(H, W, (1, 3)), psp_matrix_T(H, W, (1, 2)),
         psp_matrix_T(H, W, (2, 4))], axis=1).T).astype(jnp.bfloat16)

    kernel = build_mqa_kernel(Ck, Co, L, Bt, scale)

    def const(a):   # constant index_map -> resident in VMEM across grid steps
        return pl.BlockSpec(a.shape, lambda g: (0, 0))

    cp_kwargs = dict(dimension_semantics=("parallel",))
    vl = _vmem_limit_bytes()
    if vl is not None:
        cp_kwargs["vmem_limit_bytes"] = vl

    out_flat = pl.pallas_call(
        kernel,
        out_shape=jax.ShapeDtypeStruct((Co, B * L), out_dtype),
        grid=(B // Bt,),
        in_specs=[pl.BlockSpec((Ctot + 1, Bt * L), lambda g: (0, g)),
                  const(Wbd), const(PcatT),
                  const(params["ww"]), const(params["bw"])],
        out_specs=pl.BlockSpec((Co, Bt * L), lambda g: (0, g)),
        compiler_params=pltpu.CompilerParams(**cp_kwargs),
    )(X, Wbd, PcatT, params["ww"], params["bw"])

    return out_flat.reshape(Co, B, H, W).transpose(1, 0, 2, 3)


# ---------------------------------------------------------------------------
# Deterministic parameter construction (1x1 conv + inference-mode BN folded).
# ---------------------------------------------------------------------------
def make_params(key, C1, C2, C3, C4, Ck, Co):
    ks = jax.random.split(key, 7)

    def conv_bn(k, cin, cout):
        k1, k2, k3, k4, k5, k6 = jax.random.split(k, 6)
        w = 0.2 * jax.random.normal(k1, (cout, cin), jnp.float32)
        b = 0.1 * jax.random.normal(k2, (cout,), jnp.float32)
        gamma = 1.0 + 0.1 * jax.random.normal(k3, (cout,), jnp.float32)
        beta = 0.1 * jax.random.normal(k4, (cout,), jnp.float32)
        mean = 0.1 * jax.random.normal(k5, (cout,), jnp.float32)
        var = 1.0 + 0.1 * jnp.abs(jax.random.normal(k6, (cout,), jnp.float32))
        inv = gamma / jnp.sqrt(var + 1e-5)
        return w * inv[:, None], ((b - mean) * inv + beta)[:, None]

    wk, bk = conv_bn(ks[0], C1, Ck)      # f_key == f_query (shared module)
    wv, bv = conv_bn(ks[1], C1, Ck)      # f_value (value_channels == key_channels)
    wq2, bq2 = conv_bn(ks[2], C2, Ck)
    wq3, bq3 = conv_bn(ks[3], C3, Ck)
    wq4, bq4 = conv_bn(ks[4], C4, Ck)
    # NOTE: the PyTorch module zero-initializes W (weight and bias), which would
    # make the forward output identically zero.  We use small nonzero values to
    # exercise the kernel; semantics of the forward computation are unchanged.
    ww = 0.2 * jax.random.normal(ks[5], (Co, Ck), jnp.float32)
    bw = (0.1 * jax.random.normal(ks[6], (Co,), jnp.float32))[:, None]
    return dict(wk=wk, bk=bk, wv=wv, bv=bv, wq2=wq2, bq2=bq2,
                wq3=wq3, bq3=bq3, wq4=wq4, bq4=bq4, ww=ww, bw=bw)


# ---------------------------------------------------------------------------
# Pure-JAX reference (for correctness checking).
# ---------------------------------------------------------------------------
def multi_query_attention_ref(x1, x2, x3, x4, params, key_channels):
    B = x1.shape[0]
    scale = float(key_channels) ** (-0.5)
    p1t = jnp.asarray(psp_matrix_T(x1.shape[2], x1.shape[3], (1, 3)))
    p2t = jnp.asarray(psp_matrix_T(x2.shape[2], x2.shape[3], (1, 2)))
    p3t = jnp.asarray(psp_matrix_T(x3.shape[2], x3.shape[3], (2, 4)))

    def cbr(w, b, x):
        xf = x.reshape(x.shape[0], x.shape[1], -1)
        return jnp.maximum(jnp.einsum('oc,bcl->bol', w, xf) + b[None], 0.0)

    sm = lambda s: jax.nn.softmax(s, axis=-1)

    kf = cbr(params['wk'], params['bk'], x1)
    vf = cbr(params['wv'], params['bv'], x1)
    K1 = jnp.einsum('bcl,lp->bcp', kf, p1t)
    V1 = jnp.einsum('bcl,lp->bcp', vf, p1t)
    A1 = sm(scale * jnp.einsum('bcp,bcq->bpq', K1, K1))
    QKV1 = jnp.einsum('bpq,bcq->bpc', A1, V1)

    q2 = cbr(params['wq2'], params['bq2'], x2)
    Q2 = jnp.einsum('bcl,lp->bpc', q2, p2t)
    A2 = sm(scale * jnp.einsum('bpc,bqc->bpq', Q2, QKV1))
    QKV2 = jnp.einsum('bpq,bqc->bpc', A2, QKV1)

    q3 = cbr(params['wq3'], params['bq3'], x3)
    Q3 = jnp.einsum('bcl,lp->bpc', q3, p3t)
    A3 = sm(scale * jnp.einsum('bpc,bqc->bpq', Q3, QKV2))
    QKV3 = jnp.einsum('bpq,bqc->bpc', A3, QKV2)

    q4 = cbr(params['wq4'], params['bq4'], x4)
    A4 = sm(scale * jnp.einsum('bcl,bqc->blq', q4, QKV3))
    QKVn = jnp.einsum('blq,bqc->blc', A4, QKV3)

    out = jnp.einsum('oc,blc->bol', params['ww'], QKVn) + params['bw'][None]
    return out.reshape(B, -1, x4.shape[2], x4.shape[3])


if __name__ == "__main__":
    B = 2
    C1, C2, C3, C4 = 8, 6, 4, 8      # in_channels, in_channels02/03/04
    Ck = 32                          # key_channels == value_channels
    Co = C1                          # out_channels defaults to in_channels
    H = W = 16

    key = jax.random.PRNGKey(0)
    kx1, kx2, kx3, kx4, kp = jax.random.split(key, 5)
    x1 = jax.random.normal(kx1, (B, C1, H, W), jnp.float32)
    x2 = jax.random.normal(kx2, (B, C2, H, W), jnp.float32)
    x3 = jax.random.normal(kx3, (B, C3, H, W), jnp.float32)
    x4 = jax.random.normal(kx4, (B, C4, H, W), jnp.float32)

    params = make_params(kp, C1, C2, C3, C4, Ck, Co)

    out = jax.block_until_ready(
        multi_query_attention_pallas(x1, x2, x3, x4, params, Ck))
    assert out.shape == (B, Co, H, W), out.shape

    # Check 1: reference fed the same bf16-rounded activations / conv weights /
    # biases the kernel uses.  Remaining residual = bf16 operands on the L-wide
    # matmuls (pooling, stage-4 scores and tail), accumulation order, and the
    # approximate stage-4 reciprocal; 0.1 is ~5% of max|out| at these shapes.
    rt = lambda a: a.astype(jnp.bfloat16).astype(jnp.float32)
    params_m = dict(params)
    for k in ("wk", "wv", "wq2", "wq3", "wq4", "bk", "bv", "bq2", "bq3", "bq4"):
        params_m[k] = rt(params[k])
    ref_m = jax.block_until_ready(
        multi_query_attention_ref(rt(x1), rt(x2), rt(x3), rt(x4), params_m, Ck))
    err_tight = float(jnp.max(jnp.abs(out - ref_m)))
    assert err_tight < 1e-1, f"kernel vs bf16-matched reference: {err_tight}"

    # Check 2: loose sanity check against the pure-f32 reference (bf16 MXU
    # operands only perturb the result slightly; error stays far below scale).
    ref = jax.block_until_ready(
        multi_query_attention_ref(x1, x2, x3, x4, params, Ck))
    err_f32 = float(jnp.max(jnp.abs(out - ref)))
    assert err_f32 < 0.25, f"kernel vs f32 reference: {err_f32}"

    print("KERNEL_OK")
</pallas_src>

<mosaic_0001>
module attributes {stable_mosaic.version = 11 : i64} {
  func.func @kernel(%arg0: i32, %arg1: memref<27x256xbf16, #tpu.memory_space<vmem>>, %arg2: memref<160x27xbf16, #tpu.memory_space<vmem>>, %arg3: memref<35x256xbf16, #tpu.memory_space<vmem>>, %arg4: memref<8x32xf32, #tpu.memory_space<vmem>>, %arg5: memref<8x1xf32, #tpu.memory_space<vmem>>, %arg6: memref<8x256xf32, #tpu.memory_space<vmem>>) attributes {dimension_semantics = [#tpu.dimension_semantics<parallel>], iteration_bounds = array<i64: 2>, scalar_prefetch = 0 : i64, scratch_operands = 0 : i64, tpu.core_type = #tpu.core_type<tc>, window_params = [{transform_indices = @transform_0, window_bounds = array<i64: 27, 256>}, {pipeline_mode = #tpu.pipeline_mode<synchronous>, transform_indices = @transform_1, window_bounds = array<i64: 160, 27>}, {pipeline_mode = #tpu.pipeline_mode<synchronous>, transform_indices = @transform_2, window_bounds = array<i64: 35, 256>}, {pipeline_mode = #tpu.pipeline_mode<synchronous>, transform_indices = @transform_3, window_bounds = array<i64: 8, 32>}, {pipeline_mode = #tpu.pipeline_mode<synchronous>, transform_indices = @transform_4, window_bounds = array<i64: 8, 1>}, {transform_indices = @transform_5, window_bounds = array<i64: 8, 256>}]} {
    %c0 = arith.constant 0 : index
    %c0_0 = arith.constant 0 : index
    %0 = vector.load %arg2[%c0, %c0_0] : memref<160x27xbf16, #tpu.memory_space<vmem>>, vector<160x27xbf16>
    %c0_1 = arith.constant 0 : index
    %c0_2 = arith.constant 0 : index
    %1 = vector.load %arg1[%c0_1, %c0_2] : memref<27x256xbf16, #tpu.memory_space<vmem>>, vector<27x256xbf16>
    %cst = arith.constant dense<0.000000e+00> : vector<160x256xf32>
    %2 = tpu.matmul %0, %1, %cst {dimension_numbers = #tpu.dot_dimension_numbers<[1], [0], [0], [1], [0, 0, 1, 1], [], []>} : vector<160x27xbf16>, vector<27x256xbf16>, vector<160x256xf32> -> vector<160x256xf32>
    %cst_3 = arith.constant 0.000000e+00 : f32
    %3 = vector.broadcast %cst_3 : f32 to vector<160x256xf32>
    %4 = arith.maximumf %2, %3 : vector<160x256xf32>
    %5 = vector.extract_strided_slice %4 {offsets = [0, 0], sizes = [128, 256], strides = [1, 1]} : vector<160x256xf32> to vector<128x256xf32>
    %6 = arith.truncf %5 : vector<128x256xf32> to vector<128x256xbf16>
    %7 = vector.extract_strided_slice %4 {offsets = [128, 0], sizes = [32, 256], strides = [1, 1]} : vector<160x256xf32> to vector<32x256xf32>
    %8 = arith.truncf %7 : vector<32x256xf32> to vector<32x256xbf16>
    %c0_4 = arith.constant 0 : index
    %c0_5 = arith.constant 0 : index
    %9 = vector.load %arg3[%c0_4, %c0_5] : memref<35x256xbf16, #tpu.memory_space<vmem>>, vector<35x256xbf16>
    %c0_6 = arith.constant 0 : index
    %c0_7 = arith.constant 0 : index
    %10 = vector.load %arg4[%c0_6, %c0_7] : memref<8x32xf32, #tpu.memory_space<vmem>>, vector<8x32xf32>
    %c0_8 = arith.constant 0 : index
    %c0_9 = arith.constant 0 : index
    %11 = vector.load %arg5[%c0_8, %c0_9] : memref<8x1xf32, #tpu.memory_space<vmem>>, vector<8x1xf32>
    %cst_10 = arith.constant dense<0.000000e+00> : vector<35x128xf32>
    %12 = tpu.matmul %9, %6, %cst_10 {dimension_numbers = #tpu.dot_dimension_numbers<[1], [1], [0], [0], [0, 0, 1, 0], [], []>} : vector<35x256xbf16>, vector<128x256xbf16>, vector<35x128xf32> -> vector<35x128xf32>
    %13 = vector.extract_strided_slice %12 {offsets = [0, 0], sizes = [10, 32], strides = [1, 1]} : vector<35x128xf32> to vector<10x32xf32>
    %14 = vector.extract_strided_slice %12 {offsets = [0, 32], sizes = [10, 32], strides = [1, 1]} : vector<35x128xf32> to vector<10x32xf32>
    %15 = vector.extract_strided_slice %12 {offsets = [10, 64], sizes = [5, 32], strides = [1, 1]} : vector<35x128xf32> to vector<5x32xf32>
    %16 = vector.extract_strided_slice %12 {offsets = [15, 96], sizes = [20, 32], strides = [1, 1]} : vector<35x128xf32> to vector<20x32xf32>
    %cst_11 = arith.constant dense<0.000000e+00> : vector<10x10xf32>
    %17 = tpu.matmul %13, %13, %cst_11 {dimension_numbers = #tpu.dot_dimension_numbers<[1], [1], [0], [0], [0, 0, 1, 0], [], []>} : vector<10x32xf32>, vector<10x32xf32>, vector<10x10xf32> -> vector<10x10xf32>
    %cst_12 = arith.constant 0.176776692 : f32
    %18 = vector.broadcast %cst_12 : f32 to vector<10x10xf32>
    %19 = arith.mulf %18, %17 : vector<10x10xf32>
    %cst_13 = arith.constant dense<0xFF800000> : vector<10xf32>
    %20 = vector.multi_reduction <maximumf>, %19, %cst_13 [1] : vector<10x10xf32> to vector<10xf32>
    %21 = vector.shape_cast %20 : vector<10xf32> to vector<10x1xf32>
    %22 = vector.broadcast %21 : vector<10x1xf32> to vector<10x10xf32>
    %23 = arith.subf %19, %22 : vector<10x10xf32>
    %24 = math.exp %23 : vector<10x10xf32>
    %cst_14 = arith.constant dense<0.000000e+00> : vector<10xf32>
    %25 = vector.multi_reduction <add>, %24, %cst_14 [1] : vector<10x10xf32> to vector<10xf32>
    %26 = vector.shape_cast %25 : vector<10xf32> to vector<10x1xf32>
    %27 = vector.broadcast %26 : vector<10x1xf32> to vector<10x10xf32>
    %28 = arith.divf %24, %27 : vector<10x10xf32>
    %cst_15 = arith.constant dense<0.000000e+00> : vector<10x32xf32>
    %29 = tpu.matmul %28, %14, %cst_15 {dimension_numbers = #tpu.dot_dimension_numbers<[1], [0], [0], [1], [0, 0, 1, 1], [], []>} : vector<10x10xf32>, vector<10x32xf32>, vector<10x32xf32> -> vector<10x32xf32>
    %cst_16 = arith.constant dense<0.000000e+00> : vector<5x10xf32>
    %30 = tpu.matmul %15, %29, %cst_16 {dimension_numbers = #tpu.dot_dimension_numbers<[1], [1], [0], [0], [0, 0, 1, 0], [], []>} : vector<5x32xf32>, vector<10x32xf32>, vector<5x10xf32> -> vector<5x10xf32>
    %cst_17 = arith.constant 0.176776692 : f32
    %31 = vector.broadcast %cst_17 : f32 to vector<5x10xf32>
    %32 = arith.mulf %31, %30 : vector<5x10xf32>
    %cst_18 = arith.constant dense<0xFF800000> : vector<5xf32>
    %33 = vector.multi_reduction <maximumf>, %32, %cst_18 [1] : vector<5x10xf32> to vector<5xf32>
    %34 = vector.shape_cast %33 : vector<5xf32> to vector<5x1xf32>
    %35 = vector.broadcast %34 : vector<5x1xf32> to vector<5x10xf32>
    %36 = arith.subf %32, %35 : vector<5x10xf32>
    %37 = math.exp %36 : vector<5x10xf32>
    %cst_19 = arith.constant dense<0.000000e+00> : vector<5xf32>
    %38 = vector.multi_reduction <add>, %37, %cst_19 [1] : vector<5x10xf32> to vector<5xf32>
    %39 = vector.shape_cast %38 : vector<5xf32> to vector<5x1xf32>
    %40 = vector.broadcast %39 : vector<5x1xf32> to vector<5x10xf32>
    %41 = arith.divf %37, %40 : vector<5x10xf32>
    %cst_20 = arith.constant dense<0.000000e+00> : vector<5x32xf32>
    %42 = tpu.matmul %41, %29, %cst_20 {dimension_numbers = #tpu.dot_dimension_numbers<[1], [0], [0], [1], [0, 0, 1, 1], [], []>} : vector<5x10xf32>, vector<10x32xf32>, vector<5x32xf32> -> vector<5x32xf32>
    %cst_21 = arith.constant dense<0.000000e+00> : vector<20x5xf32>
    %43 = tpu.matmul %16, %42, %cst_21 {dimension_numbers = #tpu.dot_dimension_numbers<[1], [1], [0], [0], [0, 0, 1, 0], [], []>} : vector<20x32xf32>, vector<5x32xf32>, vector<20x5xf32> -> vector<20x5xf32>
    %cst_22 = arith.constant 0.176776692 : f32
    %44 = vector.broadcast %cst_22 : f32 to vector<20x5xf32>
    %45 = arith.mulf %44, %43 : vector<20x5xf32>
    %cst_23 = arith.constant dense<0xFF800000> : vector<20xf32>
    %46 = vector.multi_reduction <maximumf>, %45, %cst_23 [1] : vector<20x5xf32> to vector<20xf32>
    %47 = vector.shape_cast %46 : vector<20xf32> to vector<20x1xf32>
    %48 = vector.broadcast %47 : vector<20x1xf32> to vector<20x5xf32>
    %49 = arith.subf %45, %48 : vector<20x5xf32>
    %50 = math.exp %49 : vector<20x5xf32>
    %cst_24 = arith.constant dense<0.000000e+00> : vector<20xf32>
    %51 = vector.multi_reduction <add>, %50, %cst_24 [1] : vector<20x5xf32> to vector<20xf32>
    %52 = vector.shape_cast %51 : vector<20xf32> to vector<20x1xf32>
    %53 = vector.broadcast %52 : vector<20x1xf32> to vector<20x5xf32>
    %54 = arith.divf %50, %53 : vector<20x5xf32>
    %cst_25 = arith.constant dense<0.000000e+00> : vector<20x32xf32>
    %55 = tpu.matmul %54, %42, %cst_25 {dimension_numbers = #tpu.dot_dimension_numbers<[1], [0], [0], [1], [0, 0, 1, 1], [], []>} : vector<20x5xf32>, vector<5x32xf32>, vector<20x32xf32> -> vector<20x32xf32>
    %cst_26 = arith.constant 0.176776692 : f32
    %56 = vector.broadcast %cst_26 : f32 to vector<20x32xf32>
    %57 = arith.mulf %55, %56 : vector<20x32xf32>
    %58 = arith.truncf %57 : vector<20x32xf32> to vector<20x32xbf16>
    %cst_27 = arith.constant dense<0.000000e+00> : vector<20x256xf32>
    %59 = tpu.matmul %58, %8, %cst_27 {dimension_numbers = #tpu.dot_dimension_numbers<[1], [0], [0], [1], [0, 0, 1, 1], [], []>} : vector<20x32xbf16>, vector<32x256xbf16>, vector<20x256xf32> -> vector<20x256xf32>
    %cst_28 = arith.constant dense<0xFF800000> : vector<256xf32>
    %60 = vector.multi_reduction <maximumf>, %59, %cst_28 [0] : vector<20x256xf32> to vector<256xf32>
    %61 = vector.shape_cast %60 : vector<256xf32> to vector<1x256xf32>
    %62 = vector.broadcast %61 : vector<1x256xf32> to vector<20x256xf32>
    %63 = arith.subf %59, %62 : vector<20x256xf32>
    %64 = math.exp %63 : vector<20x256xf32>
    %cst_29 = arith.constant dense<0.000000e+00> : vector<256xf32>
    %65 = vector.multi_reduction <add>, %64, %cst_29 [0] : vector<20x256xf32> to vector<256xf32>
    %66 = vector.shape_cast %65 : vector<256xf32> to vector<1x256xf32>
    %67 = tpu.reciprocal %66 {approx = true} : vector<1x256xf32> -> vector<1x256xf32>
    %68 = vector.broadcast %67 : vector<1x256xf32> to vector<20x256xf32>
    %69 = arith.mulf %64, %68 : vector<20x256xf32>
    %cst_30 = arith.constant dense<0.000000e+00> : vector<8x20xf32>
    %70 = tpu.matmul %10, %55, %cst_30 {dimension_numbers = #tpu.dot_dimension_numbers<[1], [1], [0], [0], [0, 0, 1, 0], [], []>} : vector<8x32xf32>, vector<20x32xf32>, vector<8x20xf32> -> vector<8x20xf32>
    %71 = arith.truncf %70 : vector<8x20xf32> to vector<8x20xbf16>
    %72 = arith.truncf %69 : vector<20x256xf32> to vector<20x256xbf16>
    %cst_31 = arith.constant dense<0.000000e+00> : vector<8x256xf32>
    %73 = tpu.matmul %71, %72, %cst_31 {dimension_numbers = #tpu.dot_dimension_numbers<[1], [0], [0], [1], [0, 0, 1, 1], [], []>} : vector<8x20xbf16>, vector<20x256xbf16>, vector<8x256xf32> -> vector<8x256xf32>
    %74 = vector.broadcast %11 : vector<8x1xf32> to vector<8x256xf32>
    %75 = arith.addf %73, %74 : vector<8x256xf32>
    %c0_32 = arith.constant 0 : index
    %c0_33 = arith.constant 0 : index
    %76 = vector.load %arg6[%c0_32, %c0_33] : memref<8x256xf32, #tpu.memory_space<vmem>>, vector<8x256xf32>
    tpu.vector_store %arg6[%c0_32, %c0_33], %75 {strides = array<i32>} : memref<8x256xf32, #tpu.memory_space<vmem>>, vector<8x256xf32>,
    return
  }
  func.func @transform_0(%arg0: i32) -> (i32, i32) {
    %c0_i32 = arith.constant 0 : i32
    %c0_i32_0 = arith.constant 0 : i32
    return %c0_i32, %arg0 : i32, i32
  }
  func.func @transform_1(%arg0: i32) -> (i32, i32) {
    %c0_i32 = arith.constant 0 : i32
    %c0_i32_0 = arith.constant 0 : i32
    %c0_i32_1 = arith.constant 0 : i32
    return %c0_i32, %c0_i32_0 : i32, i32
  }
  func.func @transform_2(%arg0: i32) -> (i32, i32) {
    %c0_i32 = arith.constant 0 : i32
    %c0_i32_0 = arith.constant 0 : i32
    %c0_i32_1 = arith.constant 0 : i32
    return %c0_i32, %c0_i32_0 : i32, i32
  }
  func.func @transform_3(%arg0: i32) -> (i32, i32) {
    %c0_i32 = arith.constant 0 : i32
    %c0_i32_0 = arith.constant 0 : i32
    %c0_i32_1 = arith.constant 0 : i32
    return %c0_i32, %c0_i32_0 : i32, i32
  }
  func.func @transform_4(%arg0: i32) -> (i32, i32) {
    %c0_i32 = arith.constant 0 : i32
    %c0_i32_0 = arith.constant 0 : i32
    %c0_i32_1 = arith.constant 0 : i32
    return %c0_i32, %c0_i32_0 : i32, i32
  }
  func.func @transform_5(%arg0: i32) -> (i32, i32) {
    %c0_i32 = arith.constant 0 : i32
    %c0_i32_0 = arith.constant 0 : i32
    return %c0_i32, %arg0 : i32, i32
  }
}

</mosaic_0001>

<bundles_post_ra>
// kernel: tpu_custom_call.1
= control target key start
LH: loop header
LB: loop body
LE: loop exit
PB: predicated region body
PF: predicated region fallthrough
CT: control target
= control target key end

     0   :  { %10 = vsyncpa [#allocation4], 0  ;;  %s1904_s0 = inlined_call_operand.vmem [shape: bf16[27,512], index: 0, kind: input, shape index: {}]   ;;  %s1905_s1 = inlined_call_operand.vmem [shape: bf16[160,27], index: 1, kind: input, shape index: {}]   ;;  %s1906_s2 = inlined_call_operand.vmem [shape: bf16[35,256], index: 2, kind: input, shape index: {}]   ;;  %s1907_s3 = inlined_call_operand.vmem [shape: f32[8,32], index: 3, kind: input, shape index: {}]   ;;  %s1908_s4 = inlined_call_operand.vmem [shape: f32[8,1], index: 4, kind: input, shape index: {}]   ;;  %s1909_s5 = inlined_call_operand.hbm [shape: f32[8,512], index: 5, kind: output, shape index: {}]  }
   0x1   :  { %12 = vsyncpa [#allocation4 + $0x1], 0  ;;  %s1645_s18 = smov 0   ;;  %s1647_s19 = smov 0  }
   0x2   :  { %s1649_s20 = smov 0   ;;  %s1651_s21 = smov 0  }
   0x3 LB: > { %s1303_s22 = sadd.s32 4294967295, %s1608_s21   ;;  %s1304_s23 = sadd.s32 4294967294, %s1608_s21   ;;  %s1608_s21 = sphi %s1651_s21, %s1915_s21   ;;  %s1604_s20 = sphi %s1649_s20, %s1914_s20   ;;  %s1600_s19 = sphi %s1647_s19, %s1913_s19   ;;  %s1596_s18 = sphi %s1645_s18, %s1912_s18  }
   0x4   : > { %s1668_s24 = sadd.s32 1, %s1608_s21   ;;  %s25_s25 = sadd.s32 1, %s1604_s20 }
   0x5   : > { %s22_s26 = ssub.s32 %s1608_s21, %s1668_s24  ;;  %p32_p0 = scmp.ne.s32.totalorder %s1604_s20, %s1600_s19 }
   0x6   : > { %p23_p1 = scmp.eq.s32.totalorder %s22_s26, 0  ;;  %p33_p2 = scmp.eq.s32.totalorder %s1608_s21, 0 }
   0x7   : > { %p146_p3 = scmp.eq.s32.totalorder %s1303_s22, 1  ;;  %p151_p4 = scmp.ne.s32.totalorder %s1600_s19, %s1596_s18 }
   0x8   : > { %s1681_s27 = scalar_select %p23_p1, %s1604_s20, %s25_s25  }
   0x9   : > { %p34_p5 = por %p33_p2, %p32_p0  ;;  %p1683_p6 = por %p146_p3, %p32_p0 }
   0xa   : > { %p152_p7 = scmp.eq.s32.totalorder %s1304_s23, 1  ;;  %p1306_p9 = scmp.ge.s32.totalorder %s1608_s21, 2 }
   0xc   : > { %p1687_p8 = por %p152_p7, %p151_p4  ;;  %180 = sbr.rel (%p1306_p9) target bundleno = 25 (0x19), region = 32 }
  0x11   : > { %183 = sbr.rel (!%p34_p5) target bundleno = 25 (0x19), region = 36  ;;  %s185_s30 = sand.u32 (%p34_p5), 1, %s1604_s20  }
  0x12   : > { %s1440_s6 = sshll.u32 (%p34_p5), %s1608_s21, 3  ;;  %s1307_s7 = sshll.u32 (%p34_p5), %s185_s30, 5 }
  0x13   : > { %s190_s10 = scalar_lea.vmem (%p34_p5), %s1904_s0, %s1440_s6  ;;  %s187_s11 = scalar_lea.vmem (%p34_p5), [#allocation2], %s1307_s7 }
  0x14   : > { %v225_v0 = vld [vmem:[%s190_s10] sm:$0xff] (%p34_p5)  ;;  %v227_v1 = vld [vmem:[%s190_s10 + $0x10] sm:$0xff] (%p34_p5) }
  0x15   : > { %v229_v2 = vld [vmem:[%s190_s10 + $0x20] sm:$0xff] (%p34_p5)  ;;  %226 = vst [vmem:[%s187_s11] sm:$0xff] (%p34_p5), %v225_v0  ;;  %v231_v3 = vld [vmem:[%s190_s10 + $0x30] sm:$0xff] (%p34_p5) }
  0x16   : > { %228 = vst [vmem:[%s187_s11 + $0x8] sm:$0xff] %v227_v1 }
  0x17   : > { %230 = vst [vmem:[%s187_s11 + $0x10] sm:$0xff] %v229_v2 }
  0x18   : > { %232 = vst [vmem:[%s187_s11 + $0x18] sm:$0xff] %v231_v3 }
  0x19 PF: > { %p1310_p10 = scmp.ge.s32.totalorder %s1608_s21, 1  ;;  %p237_p11 = scmp.lt.s32.totalorder %s1608_s21, 3 }
  0x1b   : > { %p238_p12 = pnand %p1310_p10, %p237_p11 }
  0x1c   : > { %s1702_s12 = sand.u32 (!%p238_p12), 1, %s1600_s19   ;;  %s1611_s25 = smov (!%p238_p12), 96  }
  0x1d   : > { %241 = sbr.rel (%p238_p12) target bundleno = 2479 (0x9af), region = 74  ;;  %s1311_s13 = sshll.u32 (!%p238_p12), %s1702_s12, 5 }
  0x1e   : > { %s246_s14 = scalar_lea.vmem (!%p238_p12), [#allocation2], %s1311_s13  ;;  %s1612_s26 = smov (!%p238_p12), 64  }
  0x1f   : > { %s1613_s30 = smov (!%p238_p12), 32   ;;  %s1459_s15 = sshll.u32 (!%p238_p12), %s1303_s22, 4 }
  0x20   : > { %s1312_s16 = sshll.u32 (!%p238_p12), %s1702_s12, 4  ;;  %s1223_s7 = scalar_lea.sflag (!%p238_p12), [#allocation4], %s1702_s12 }
  0x21   : > { %s1566_s11 = scalar_lea.hbm (!%p238_p12), %s1909_s5, 32 }
  0x22   : > { %vm397_vm0 = vcmask 1044480   ;;  %vm398_vm1 = vcmask 1045504   ;;  %v1610_v4 = vmov 65535   ;;  %v1363_v7 = vld [vmem:[%s246_s14 + $0x10] sm:$0xf]  ;;  %v1441_v21 = vld [vmem:[%s1905_s1] sm:$0xff] }
  0x23   : > { %v399_v5 = vsel %vm397_vm0, 4294967295, %v1610_v4  ;;  %v1454_v8 = vld [vmem:[%s246_s14 + $0x14] sm:$0x30]  ;;  %v1453_v9 = vld [vmem:[%s246_s14 + $0x14] sm:$0xf]  ;;  %vm366_vm2 = vcmask 220160  }
  0x24   : > { %v400_v6 = vsel %vm398_vm1, %v399_v5, 0  ;;  %v1364_v10 = vor.u32 %v1454_v8, %v1363_v7  ;;  %v1365_v11 = vld [vmem:[%s246_s14 + $0x18] sm:$0x30]  ;;  %v1355_v13 = vld [vmem:[%s246_s14] sm:$0xf]  ;;  %v1442_v22 = vld [vmem:[%s1905_s1 + $0x8] sm:$0xff] }
  0x25   : > { %v1368_v12 = vor.u32 %v1453_v9, %v1365_v11  ;;  %v1452_v14 = vld [vmem:[%s246_s14 + $0x4] sm:$0xf0]  ;;  %v1451_v16 = vld [vmem:[%s246_s14 + $0x4] sm:$0xf]  ;;  %v1357_v17 = vld [vmem:[%s246_s14 + $0x8] sm:$0xf0] }
  0x26   : > { %v402_v15 = vand.u32 %v1364_v10, %v400_v6  ;;  %v1356_v19 = vor.u32 %v1452_v14, %v1355_v13  ;;  %v1360_v20 = vor.u32 %v1451_v16, %v1357_v17  ;;  %v1443_v23 = vld [vmem:[%s1905_s1 + $0x10] sm:$0xff]  ;;  %v1444_v24 = vld [vmem:[%s1905_s1 + $0x18] sm:$0xff]  ;;  %v1445_v25 = vld [vmem:[%s1905_s1 + $0x20] sm:$0xff]  ;;  %vm665_vm3 = vcmask 261120  }
  0x27   : > { %v405_v18 = vand.u32 %v1368_v12, %v400_v6  ;;  %v1446_v26 = vld [vmem:[%s1905_s1 + $0x28] sm:$0xff]  ;;  %v1447_v27 = vld [vmem:[%s1905_s1 + $0x30] sm:$0xff]  ;;  %v1448_v28 = vld [vmem:[%s1905_s1 + $0x38] sm:$0xff]  ;;  %vm869_vm4 = vcmask 1040384   ;;  %vm758_vm5 = vcmask 1041408   ;;  %vm697_vm6 = vcmask 80896  }
  0x28   : > { %413 = vmatpush.bf16.msra.mxu0 %v402_v15  ;;  %vm701_vm7 = vcmask 74752   ;;  %vm816_vm1 = vcmask 77824  }
  0x29   : > { %472 = vmatpush.bf16.msra.mxu1 %v405_v18 }
  0x2c   : > { %414 = vmatpush.bf16.msra.mxu0 %v1356_v19 }
  0x2d   : > { %473 = vmatpush.bf16.msra.mxu1 %v1360_v20 }
  0x2f   : > { %1369 = vmatmul.msk.bf16.vlgmr.msra.gmra.mxu0 %vm366_vm2, %v1441_v21 }
  0x30   : > { %1379 = vmatmul.msk.bf16.vlgmr.msra.gmra.mxu1 %vm366_vm2, %v1441_v21 }
  0x3f   : > { %1370 = vmatmul.msk.bf16.gmra.mxu0 %vm366_vm2, %v1442_v22 }
  0x40   : > { %1380 = vmatmul.msk.bf16.gmra.mxu1 %vm366_vm2, %v1442_v22 }
  0x4f   : > { %1371 = vmatmul.msk.bf16.gmra.mxu0 %vm366_vm2, %v1443_v23 }
  0x50   : > { %1381 = vmatmul.msk.bf16.gmra.mxu1 %vm366_vm2, %v1443_v23 }
  0x5f   : > { %1372 = vmatmul.msk.bf16.gmra.mxu0 %vm366_vm2, %v1444_v24 }
  0x60   : > { %1382 = vmatmul.msk.bf16.gmra.mxu1 %vm366_vm2, %v1444_v24 }
  0x6f   : > { %1373 = vmatmul.msk.bf16.gmra.mxu0 %vm366_vm2, %v1445_v25 }
  0x70   : > { %1383 = vmatmul.msk.bf16.gmra.mxu1 %vm366_vm2, %v1445_v25 }
  0x7f   : > { %1374 = vmatmul.msk.bf16.gmra.mxu0 %vm366_vm2, %v1446_v26 }
  0x80   : > { %1384 = vmatmul.msk.bf16.gmra.mxu1 %vm366_vm2, %v1446_v26 }
  0x8f   : > { %1375 = vmatmul.msk.bf16.gmra.mxu0 %vm366_vm2, %v1447_v27 }
  0x90   : > { %1385 = vmatmul.msk.bf16.gmra.mxu1 %vm366_vm2, %v1447_v27 }
  0x9f   : > { %1376 = vmatmul.msk.bf16.gmra.mxu0 %vm366_vm2, %v1448_v28 }
  0xa0   : > { %1386 = vmatmul.msk.bf16.gmra.mxu1 %vm366_vm2, %v1448_v28 }
  0xac   : > { %v416_v29 = vpop.f32.mrf.mxu0 }
  0xad   : > { %v475_v30 = vpop.f32.mrf.mxu1  ;;  %v525_v32 = vmax.f32 %v416_v29, 0.0 }
  0xae   : > { %v526_v35 = vmax.f32 %v475_v30, 0.0 }
  0xb4   : > { %v418_v31 = vpop.f32.mrf.mxu0 }
  0xb5   : > { %v527_v33 = vmax.f32 %v418_v31, 0.0  ;;  %v477_v34 = vpop.f32.mrf.mxu1 }
  0xb6   : > { %v528_v36 = vmax.f32 %v477_v34, 0.0 }
  0xb7   : > { %v1746_v37 = vpack.c.bf16 %v527_v33, %v525_v32 }
  0xb8   : > { %v1748_v38 = vpack.c.bf16 %v528_v36, %v526_v35 }
  0xbc   : > { %v421_v39 = vpop.f32.mrf.mxu0 }
  0xbd   : > { %v480_v40 = vpop.f32.mrf.mxu1  ;;  %v529_v42 = vmax.f32 %v421_v39, 0.0 }
  0xbe   : > { %v530_v45 = vmax.f32 %v480_v40, 0.0 }
  0xc4   : > { %v423_v41 = vpop.f32.mrf.mxu0 }
  0xc5   : > { %v531_v43 = vmax.f32 %v423_v41, 0.0  ;;  %v482_v44 = vpop.f32.mrf.mxu1 }
  0xc6   : > { %v532_v46 = vmax.f32 %v482_v44, 0.0 }
  0xc7   : > { %v1750_v47 = vpack.c.bf16 %v531_v43, %v529_v42 }
  0xc8   : > { %v1752_v48 = vpack.c.bf16 %v532_v46, %v530_v45 }
  0xcc   : > { %v426_v49 = vpop.f32.mrf.mxu0 }
  0xcd   : > { %v485_v50 = vpop.f32.mrf.mxu1  ;;  %v533_v52 = vmax.f32 %v426_v49, 0.0  ;;  %v1391_v49 = vld [vmem:[%s1906_s2] sm:$0xf] }
  0xce   : > { %v534_v55 = vmax.f32 %v485_v50, 0.0  ;;  %v1456_v50 = vld [vmem:[%s1906_s2 + $0x4] sm:$0xf0] }
  0xd4   : > { %v428_v51 = vpop.f32.mrf.mxu0 }
  0xd5   : > { %v535_v53 = vmax.f32 %v428_v51, 0.0  ;;  %v487_v54 = vpop.f32.mrf.mxu1  ;;  %v1455_v51 = vld [vmem:[%s1906_s2 + $0x4] sm:$0xf] }
  0xd6   : > { %v536_v56 = vmax.f32 %v487_v54, 0.0  ;;  %v1401_v54 = vld [vmem:[%s1906_s2 + $0x18] sm:$0xf0] }
  0xd7   : > { %v569_v57 = vpack.c.bf16 %v535_v53, %v533_v52  ;;  %v1399_v52 = vld [vmem:[%s1906_s2 + $0x10] sm:$0xf]  ;;  %v1457_v53 = vld [vmem:[%s1906_s2 + $0x14] sm:$0xf] }
  0xd8   : > { %v570_v58 = vpack.c.bf16 %v536_v56, %v534_v55  ;;  %v1404_v56 = vor.u32 %v1457_v53, %v1401_v54 }
  0xdc   : > { %v431_v59 = vpop.f32.mrf.mxu0 }
  0xdd   : > { %v490_v60 = vpop.f32.mrf.mxu1  ;;  %v537_v62 = vmax.f32 %v431_v59, 0.0 }
  0xde   : > { %v538_v1 = vmax.f32 %v490_v60, 0.0 }
  0xe4   : > { %v433_v61 = vpop.f32.mrf.mxu0 }
  0xe5   : > { %v539_v63 = vmax.f32 %v433_v61, 0.0  ;;  %v492_v0 = vpop.f32.mrf.mxu1 }
  0xe6   : > { %v540_v2 = vmax.f32 %v492_v0, 0.0 }
  0xe7   : > { %v571_v3 = vpack.c.bf16 %v539_v63, %v537_v62 }
  0xe8   : > { %v572_v4 = vpack.c.bf16 %v540_v2, %v538_v1 }
  0xec   : > { %v436_v5 = vpop.f32.mrf.mxu0 }
  0xed   : > { %v495_v6 = vpop.f32.mrf.mxu1  ;;  %v541_v8 = vmax.f32 %v436_v5, 0.0 }
  0xee   : > { %v542_v11 = vmax.f32 %v495_v6, 0.0 }
  0xf4   : > { %v438_v7 = vpop.f32.mrf.mxu0 }
  0xf5   : > { %v543_v9 = vmax.f32 %v438_v7, 0.0  ;;  %v497_v10 = vpop.f32.mrf.mxu1 }
  0xf6   : > { %v544_v12 = vmax.f32 %v497_v10, 0.0 }
  0xf7   : > { %v573_v13 = vpack.c.bf16 %v543_v9, %v541_v8 }
  0xf8   : > { %v574_v14 = vpack.c.bf16 %v544_v12, %v542_v11 }
  0xfc   : > { %v441_v15 = vpop.f32.mrf.mxu0 }
  0xfd   : > { %v500_v16 = vpop.f32.mrf.mxu1  ;;  %v545_v43 = vmax.f32 %v441_v15, 0.0 }
  0xfe   : > { %v546_v44 = vmax.f32 %v500_v16, 0.0 }
 0x104   : > { %v443_v17 = vpop.f32.mrf.mxu0 }
 0x105   : > { %v502_v18 = vpop.f32.mrf.mxu1  ;;  %v547_v41 = vmax.f32 %v443_v17, 0.0 }
 0x106   : > { %v548_v42 = vmax.f32 %v502_v18, 0.0 }
 0x107   : > { %v575_v45 = vpack.c.bf16 %v547_v41, %v545_v43 }
 0x108   : > { %v576_v46 = vpack.c.bf16 %v548_v42, %v546_v44 }
 0x10c   : > { %v446_v19 = vpop.f32.mrf.mxu0 }
 0x10d   : > { %v505_v20 = vpop.f32.mrf.mxu1  ;;  %v549_v35 = vmax.f32 %v446_v19, 0.0 }
 0x10e   : > { %v550_v36 = vmax.f32 %v505_v20, 0.0 }
 0x114   : > { %v448_v21 = vpop.f32.mrf.mxu0 }
 0x115   : > { %v507_v22 = vpop.f32.mrf.mxu1  ;;  %v551_v33 = vmax.f32 %v448_v21, 0.0 }
 0x116   : > { %v552_v34 = vmax.f32 %v507_v22, 0.0 }
 0x117   : > { %v577_v39 = vpack.c.bf16 %v551_v33, %v549_v35 }
 0x118   : > { %v578_v40 = vpack.c.bf16 %v552_v34, %v550_v36 }
 0x11c   : > { %v451_v23 = vpop.f32.mrf.mxu0 }
 0x11d   : > { %v510_v24 = vpop.f32.mrf.mxu1  ;;  %v553_v26 = vmax.f32 %v451_v23, 0.0 }
 0x11e   : > { %v554_v29 = vmax.f32 %v510_v24, 0.0 }
 0x124   : > { %v453_v25 = vpop.f32.mrf.mxu0 }
 0x125   : > { %v555_v27 = vmax.f32 %v453_v25, 0.0  ;;  %v512_v28 = vpop.f32.mrf.mxu1 }
 0x126   : > { %v556_v30 = vmax.f32 %v512_v28, 0.0 }
 0x127   : > { %v579_v31 = vpack.c.bf16 %v555_v27, %v553_v26 }
 0x128   : > { %v580_v32 = vpack.c.bf16 %v556_v30, %v554_v29 }
 0x129   : > { %619 = vmatpush.bf16.xpose.msra.mxu2 %v579_v31 }
 0x12a   : > { %642 = vmatpush.bf16.xpose.msra.mxu3 %v580_v32 }
 0x131   : > { %620 = vmatpush.bf16.xpose.msra.mxu2 %v577_v39 }
 0x132   : > { %643 = vmatpush.bf16.xpose.msra.mxu3 %v578_v40 }
 0x139   : > { %621 = vmatpush.bf16.xpose.msra.mxu2 %v575_v45 }
 0x13a   : > { %644 = vmatpush.bf16.xpose.msra.mxu3 %v576_v46 }
 0x141   : > { %622 = vmatpush.bf16.xpose.msra.mxu2 %v573_v13 }
 0x142   : > { %645 = vmatpush.bf16.xpose.msra.mxu3 %v574_v14 }
 0x149   : > { %623 = vmatpush.bf16.xpose.msra.mxu2 %v571_v3 }
 0x14a   : > { %646 = vmatpush.bf16.xpose.msra.mxu3 %v572_v4 }
 0x151   : > { %624 = vmatpush.bf16.xpose.msra.mxu2 %v569_v57  ;;  %v589_v57 = vld [vmem:[%s1906_s2 + $0x20] sm:$0x33] }
 0x152   : > { %647 = vmatpush.bf16.xpose.msra.mxu3 %v570_v58  ;;  %v605_v58 = vunpack.c.l.b16 %v589_v57  ;;  %v606_v59 = vunpack.c.h.b16 %v589_v57 }
 0x154   : > { %v611_v60 = vpack.c.b16 %v605_v58, %v605_v58  ;;  %v612_v61 = vpack.c.b16 %v606_v59, %v606_v59 }
 0x159   : > { %625 = vmatpush.bf16.xpose.msra.mxu2 %v1750_v47  ;;  %v1393_v47 = vld [vmem:[%s1906_s2 + $0x8] sm:$0xf0] }
 0x15a   : > { %648 = vmatpush.bf16.xpose.msra.mxu3 %v1752_v48  ;;  %v1392_v48 = vor.u32 %v1456_v50, %v1391_v49 }
 0x161   : > { %626 = vmatpush.bf16.xpose.msra.mxu2 %v1746_v37  ;;  %v1396_v37 = vor.u32 %v1455_v51, %v1393_v47 }
 0x162   : > { %649 = vmatpush.bf16.xpose.msra.mxu3 %v1748_v38  ;;  %v1458_v38 = vld [vmem:[%s1906_s2 + $0x14] sm:$0xf0] }
 0x163   : > { %v1400_v55 = vor.u32 %v1458_v38, %v1399_v52 }
 0x168   : > { %627 = vmatmul.bf16.vlgmr.msra.gmra.mxu2 %v1392_v48 }
 0x169   : > { %650 = vmatmul.bf16.vlgmr.msra.gmra.mxu3 %v1396_v37 }
 0x178   : > { %632 = vmatmul.bf16.gmra.mxu2 %v1400_v55 }
 0x179   : > { %655 = vmatmul.bf16.gmra.mxu3 %v1404_v56 }
 0x188   : > { %637 = vmatmul.bf16.gmra.mxu2 %v611_v60 }
 0x189   : > { %660 = vmatmul.bf16.gmra.mxu3 %v612_v61 }
 0x1eb   : > { %v628_v62 = vpop.f32.mrf.mxu2 }
 0x1ec   : > { %v651_v63 = vpop.f32.mrf.mxu3 }
 0x1ed   : > { %v652_v3 = vadd.f32 %v651_v63, %v628_v62 }
 0x1f3   : > { %v630_v0 = vpop.f32.mrf.mxu2 }
 0x1f4   : > { %v653_v1 = vpop.f32.mrf.mxu3 }
 0x1f5   : > { %v1785_v2 = vadd.f32 %v653_v1, %v630_v0 }
 0x1f7   : > { %749 = vrot.lane.b32.xlu2 %v1785_v2, %s1611_s25  ;;  %1405 = vmatpush.xpose.msk.msrb.mxu2 %vm665_vm3, %v1785_v2  ;;  %v784_v26 = vrot.slane %v1785_v2, 2 }
 0x1fb   : > { %1406 = vmatpush.xpose.msk.msrb.mxu2 %vm665_vm3, %v652_v3  ;;  %v633_v4 = vpop.f32.mrf.mxu2 }
 0x1fc   : > { %v656_v5 = vpop.f32.mrf.mxu3 }
 0x1fd   : > { %v1791_v6 = vadd.f32 %v656_v5, %v633_v4 }
 0x1fe   : > { %1407 = vmatmul.msk.f32.vlgmr.msrb.gmra.mxu2 %vm665_vm3, %v652_v3 }
 0x1ff   : > { %747 = vrot.lane.b32.xlu2 %v652_v3, %s1611_s25  ;;  %v871_v27 = vrot.slane %v1791_v6, 7  ;;  %s1234_s25 = scalar_lea.hbm %s1909_s5, %s1459_s15 }
 0x200   : > { %s1238_s6 = sshll.u32 %s1234_s25, 4  ;;  %s1239_s6 = int_to_ptr.hbm [resolvable:$true] %s1238_s6 }
 0x201   : > { %s1560_s22 = sshra.s32 %s1239_s6, 4  ;;  %s1561_s22 = int_to_ptr.hbm [resolvable:$true] %s1560_s22 }
 0x202   : > { %s1562_s8 = scalar_lea.hbm %s1561_s22, 16  ;;  %p1567_p2 = scmp.lt.s32.totalorder %s1561_s22, %s1909_s5 }
 0x203   : > { %v635_v7 = vpop.f32.mrf.mxu2  ;;  %p1563_p13 = scmp.ne.s32.totalorder %s1561_s22, %s1562_s8  ;;  %p1568_p3 = scmp.lt.s32.totalorder %s1566_s11, %s1562_s8 }
 0x204   : > { %v658_v8 = vpop.f32.mrf.mxu3 }
 0x205   : > { %v659_v9 = vadd.f32 %v658_v8, %v635_v7  ;;  %v870_v7 = vrot.slane %v1785_v2, 7  ;;  %p1564_p0 = pnand %p1563_p13, %p1683_p6  ;;  %p1569_p4 = por %p1568_p3, %p1567_p2 }
 0x206   : > { %1408 = vmatmul.msk.f32.gmra.mxu2 %vm665_vm3, %v1785_v2 }
 0x207   : > { %v873_v13 = vrot.slane %v659_v9, 7  ;;  %v872_v8 = vsel %vm869_vm4, %v870_v7, %v871_v27  ;;  %p1565_p1 = pneg %p1564_p0 }
 0x209   : > { %v874_v28 = vsel %vm869_vm4, %v871_v27, %v873_v13  ;;  %p1570_p5 = pnand %p1569_p4, %p1565_p1 }
 0x20b   : > { %v638_v10 = vpop.f32.mrf.mxu2 }
 0x20c   : > { %v661_v11 = vpop.f32.mrf.mxu3 }
 0x20d   : > { %v662_v12 = vadd.f32 %v661_v11, %v638_v10 }
 0x20f   : > { %v875_v14 = vrot.slane %v662_v12, 7 }
 0x211   : > { %v876_v17 = vsel %vm869_vm4, %v873_v13, %v875_v14 }
 0x213   : > { %v640_v15 = vpop.f32.mrf.mxu2 }
 0x214   : > { %v663_v16 = vpop.f32.mrf.mxu3 }
 0x251   : > { %v750_v18 = vpop.permute.xlu2 %749 }
 0x252   : > { %1409 = vmatpush.msk.msrb.mxu3 %vm758_vm5, %v750_v18 }
 0x259   : > { %v748_v19 = vpop.permute.xlu2 %747 }
 0x25a   : > { %776 = vmatpush.msrb.mxu3 %v748_v19 }
 0x281   : > { %v689_v20 = vpop.f32.mrf.mxu2 }
 0x282   : > { %v695_v21 = vmul.f32 0.17677669, %v689_v20 }
 0x284   : > { %v698_v22 = vsel %vm697_vm6, %v695_v21, -inf }
 0x285   : > { %699 = vmax.xlane.f32.xlu0 %v698_v22 }
 0x289   : > { %v692_v23 = vpop.f32.mrf.mxu2 }
 0x28a   : > { %v696_v24 = vmul.f32 0.17677669, %v692_v23 }
 0x28c   : > { %v702_v25 = vsel %vm701_vm7, %v696_v24, -inf }
 0x28d   : > { %703 = vmax.xlane.f32.xlu0 %v702_v25 }
 0x2a1   : > { %785 = vrot.lane.b32.xlu0 %v784_v26, %s1612_s26  ;;  %s270_s26 = scalar_lea.vmem [#allocation3], %s1312_s16 }
 0x2a9   : > { %879 = vrot.lane.b32.xlu0 %v874_v28, %s1613_s30 }
 0x2b1   : > { %881 = vrot.lane.b32.xlu0 %v876_v17, %s1613_s30 }
 0x2f8   : > { %v700_v29 = vpop.xlane.xlu0 %699 }
 0x2f9   : > { %v705_v30 = vsub.f32 %v695_v21, %v700_v29 }
 0x2fb   : > { %v707_v31 = vmul.f32 1.442695, %v705_v30 }
 0x2fd   : > { %1506 = vpow2.f32 %v707_v31 }
 0x300   : > { %v704_v32 = vpop.xlane.xlu0 %703 }
 0x301   : > { %v706_v33 = vsub.f32 %v696_v24, %v704_v32 }
 0x303   : > { %v1507_v34 = vpop.eup %1506  ;;  %v709_v35 = vmul.f32 1.442695, %v706_v33 }
 0x304   : > { %v711_v36 = vsel %vm697_vm6, %v1507_v34, 0.0 }
 0x305   : > { %1508 = vpow2.f32 %v709_v35  ;;  %712 = vadd.xlane.f32.xlu1 %v711_v36 }
 0x30b   : > { %v1509_v39 = vpop.eup %1508 }
 0x30c   : > { %v714_v40 = vsel %vm701_vm7, %v1509_v39, 0.0 }
 0x30d   : > { %715 = vadd.xlane.f32.xlu1 %v714_v40 }
 0x313   : > { %v786_v1 = vpop.permute.xlu0 %785 }
 0x31b   : > { %v880_v26 = vpop.permute.xlu0 %879 }
 0x323   : > { %v882_v27 = vpop.permute.xlu0 %881 }
 0x378   : > { %v713_v41 = vpop.xlane.xlu1 %712 }
 0x379   : > { %1510 = vrcp.f32 %v713_v41  ;;  %v728_v46 = vand.u32 2147483648, %v713_v41  ;;  %v726_v50 = vand.u32 2147483647, %v713_v41  ;;  %vm722_vm9 = vweird.f32 %v713_v41 }
 0x37b   : > { %v729_v48 = vor.u32 1.1754944e-38, %v728_v46  ;;  %vm727_vm11 = vcmp.eq.f32.partialorder %v726_v50, 8.507059e+37 }
 0x37f   : > { %v1511_v42 = vpop.eup %1510 }
 0x380   : > { %v718_v43 = vmul.f32 %v1511_v42, %v713_v41  ;;  %v716_v44 = vpop.xlane.xlu1 %715  ;;  %vm723_vm8 = vweird.f32 %v1511_v42 }
 0x381   : > { %1512 = vrcp.f32 %v716_v44  ;;  %vm724_vm10 = vmor %vm722_vm9, %vm723_vm8  ;;  %v743_v55 = vand.u32 2147483648, %v716_v44  ;;  %v741_v57 = vand.u32 2147483647, %v716_v44  ;;  %vm737_vm13 = vweird.f32 %v716_v44 }
 0x382   : > { %v719_v45 = vsub.f32 1.0, %v718_v43 }
 0x383   : > { %v744_v59 = vor.u32 1.1754944e-38, %v743_v55  ;;  %vm742_vm15 = vcmp.eq.f32.partialorder %v741_v57, 8.507059e+37 }
 0x384   : > { %v720_v49 = vmul.f32 %v1511_v42, %v719_v45 }
 0x386   : > { %v721_v51 = vadd.f32 %v1511_v42, %v720_v49  ;;  %v1450_v49 = vld [vmem:[%s1905_s1 + $0x48] sm:$0xff] }
 0x387   : > { %v1513_v47 = vpop.eup %1512 }
 0x388   : > { %v733_v37 = vmul.f32 %v1513_v47, %v716_v44  ;;  %v725_v52 = vsel %vm724_vm10, %v1511_v42, %v721_v51  ;;  %vm738_vm12 = vweird.f32 %v1513_v47  ;;  %vm921_vm10 = vcmask 39936  }
 0x389   : > { %v730_v38 = vsel %vm727_vm11, %v729_v48, %v725_v52  ;;  %vm739_vm14 = vmor %vm737_vm13, %vm738_vm12 }
 0x38a   : > { %v734_v53 = vsub.f32 1.0, %v733_v37  ;;  %v731_v54 = vmul.f32 %v1507_v34, %v730_v38 }
 0x38c   : > { %v735_v56 = vmul.f32 %v1513_v47, %v734_v53  ;;  %1410 = vmatmul.msk.f32.vlgmr.msrb.gmra.mxu3 %vm697_vm6, %v731_v54 }
 0x38e   : > { %v736_v58 = vadd.f32 %v1513_v47, %v735_v56 }
 0x390   : > { %v740_v60 = vsel %vm739_vm14, %v1513_v47, %v736_v58 }
 0x391   : > { %v745_v61 = vsel %vm742_vm15, %v744_v59, %v740_v60 }
 0x392   : > { %v746_v62 = vmul.f32 %v1509_v39, %v745_v61  ;;  %v1449_v39 = vld [vmem:[%s1905_s1 + $0x40] sm:$0xff] }
 0x393   : > { %1377 = vmatmul.msk.bf16.gmra.mxu0 %vm366_vm2, %v1449_v39  ;;  %1387 = vmatmul.msk.bf16.gmra.mxu1 %vm366_vm2, %v1449_v39 }
 0x394   : > { %1411 = vmatmul.msk.f32.gmra.mxu3 %vm697_vm6, %v746_v62 }
 0x3a3   : > { %1378 = vmatmul.msk.bf16.gmra.mxu0 %vm366_vm2, %v1450_v49  ;;  %1388 = vmatmul.msk.bf16.gmra.mxu1 %vm366_vm2, %v1450_v49 }
 0x40f   : > { %v778_v63 = vpop.f32.mrf.mxu3 }
 0x410   : > { %v456_v55 = vpop.f32.mrf.mxu0 }
 0x417   : > { %v781_v0 = vpop.f32.mrf.mxu3 }
 0x418   : > { %1412 = vmatpush.xpose.msk.msra.mxu2 %vm665_vm3, %v781_v0  ;;  %1415 = vmatpush.msk.msra.mxu3 %vm758_vm5, %v781_v0 }
 0x41a   : > { %861 = vmatpush.msra.mxu3 %v778_v63 }
 0x41c   : > { %1413 = vmatpush.xpose.msk.msra.mxu2 %vm665_vm3, %v778_v63  ;;  %v458_v63 = vpop.f32.mrf.mxu0 }
 0x41f   : > { %1414 = vmatmul.msk.f32.vlgmr.msra.gmra.mxu2 %vm665_vm3, %v786_v1 }
 0x4a2   : > { %v812_v3 = vpop.f32.mrf.mxu2 }
 0x4a3   : > { %v815_v4 = vmul.f32 0.17677669, %v812_v3 }
 0x4a5   : > { %v817_v5 = vsel %vm816_vm1, %v815_v4, -inf }
 0x4a6   : > { %818 = vmax.xlane.f32.xlu1 %v817_v5 }
 0x4bf   : > { %877 = vrot.lane.b32.xlu1 %v872_v8, %s1613_s30  ;;  %s1236_s30 = sshll.u32 %s270_s26, 4  ;;  %s1237_s30 = int_to_ptr.vmem [resolvable:$true] %s1236_s30 }
 0x519   : > { %v819_v9 = vpop.xlane.xlu1 %818 }
 0x51a   : > { %v820_v10 = vsub.f32 %v815_v4, %v819_v9 }
 0x51c   : > { %v821_v11 = vmul.f32 1.442695, %v820_v10 }
 0x51e   : > { %1514 = vpow2.f32 %v821_v11 }
 0x524   : > { %v1515_v12 = vpop.eup %1514 }
 0x525   : > { %v823_v13 = vsel %vm816_vm1, %v1515_v12, 0.0 }
 0x526   : > { %824 = vadd.xlane.f32.xlu2 %v823_v13 }
 0x531   : > { %v878_v25 = vpop.permute.xlu1 %877 }
 0x599   : > { %v825_v14 = vpop.xlane.xlu2 %824 }
 0x59a   : > { %1516 = vrcp.f32 %v825_v14  ;;  %v837_v18 = vand.u32 2147483648, %v825_v14  ;;  %v835_v6 = vand.u32 2147483647, %v825_v14  ;;  %vm831_vm4 = vweird.f32 %v825_v14 }
 0x59c   : > { %v838_v20 = vor.u32 1.1754944e-38, %v837_v18  ;;  %vm836_vm9 = vcmp.eq.f32.partialorder %v835_v6, 8.507059e+37 }
 0x5a0   : > { %v1517_v15 = vpop.eup %1516 }
 0x5a1   : > { %v827_v16 = vmul.f32 %v1517_v15, %v825_v14  ;;  %vm832_vm7 = vweird.f32 %v1517_v15  ;;  %v461_v14 = vpop.f32.mrf.mxu0 }
 0x5a2   : > { %vm833_vm8 = vmor %vm831_vm4, %vm832_vm7 }
 0x5a3   : > { %v828_v17 = vsub.f32 1.0, %v827_v16 }
 0x5a5   : > { %v829_v2 = vmul.f32 %v1517_v15, %v828_v17 }
 0x5a7   : > { %v830_v19 = vadd.f32 %v1517_v15, %v829_v2 }
 0x5a9   : > { %v834_v21 = vsel %vm833_vm8, %v1517_v15, %v830_v19 }
 0x5aa   : > { %v839_v22 = vsel %vm836_vm9, %v838_v20, %v834_v21 }
 0x5ab   : > { %v840_v23 = vmul.f32 %v1515_v12, %v839_v22  ;;  %v561_v22 = vmax.f32 %v461_v14, 0.0 }
 0x5ad   : > { %1416 = vmatmul.msk.f32.vlgmr.msra.gmra.mxu3 %vm697_vm6, %v840_v23 }
 0x630   : > { %v863_v24 = vpop.f32.mrf.mxu3 }
 0x631   : > { %1417 = vmatpush.xpose.msk.msrb.mxu2 %vm665_vm3, %v863_v24  ;;  %1421 = vmatpush.msk.msrb.mxu3 %vm397_vm0, %v863_v24  ;;  %vm928_vm0 = vcmask 35840  }
 0x634   : > { %1418 = vmatmul.msk.f32.vlgmr.msrb.gmra.mxu2 %vm665_vm3, %v878_v25  ;;  %v463_v25 = vpop.f32.mrf.mxu0 }
 0x63c   : > { %1419 = vmatmul.msk.f32.gmra.mxu2 %vm665_vm3, %v880_v26  ;;  %v557_v26 = vmax.f32 %v456_v55, 0.0 }
 0x644   : > { %1420 = vmatmul.msk.f32.gmra.mxu2 %vm665_vm3, %v882_v27  ;;  %v559_v27 = vmax.f32 %v458_v63, 0.0 }
 0x6b7   : > { %v909_v28 = vpop.f32.mrf.mxu2 }
 0x6b8   : > { %v918_v29 = vmul.f32 0.17677669, %v909_v28  ;;  %v563_v28 = vmax.f32 %v463_v25, 0.0 }
 0x6ba   : > { %v922_v30 = vsel %vm921_vm10, %v918_v29, -inf }
 0x6bb   : > { %923 = vmax.xlane.f32.xlu1 %v922_v30 }
 0x6bf   : > { %v912_v31 = vpop.f32.mrf.mxu2 }
 0x6c0   : > { %v919_v32 = vmul.f32 0.17677669, %v912_v31  ;;  %v583_v31 = vpack.c.bf16 %v563_v28, %v561_v22 }
 0x6c2   : > { %v925_v33 = vsel %vm921_vm10, %v919_v32, -inf  ;;  %1049 = vmatpush.bf16.msra.mxu2 %v583_v31 }
 0x6c3   : > { %926 = vmax.xlane.f32.xlu0 %v925_v33 }
 0x6c7   : > { %v915_v34 = vpop.f32.mrf.mxu2 }
 0x6c8   : > { %v920_v35 = vmul.f32 0.17677669, %v915_v34  ;;  %v581_v34 = vpack.c.bf16 %v559_v27, %v557_v26 }
 0x6ca   : > { %v929_v36 = vsel %vm928_vm0, %v920_v35, -inf  ;;  %1050 = vmatpush.bf16.msra.mxu2 %v581_v34 }
 0x6cb   : > { %930 = vmax.xlane.f32.xlu2 %v929_v36  ;;  %v515_v36 = vpop.f32.mrf.mxu1 }
 0x6d3   : > { %v517_v39 = vpop.f32.mrf.mxu1 }
 0x72e   : > { %v924_v40 = vpop.xlane.xlu1 %923 }
 0x72f   : > { %v932_v41 = vsub.f32 %v918_v29, %v924_v40  ;;  %v520_v40 = vpop.f32.mrf.mxu1 }
 0x731   : > { %v935_v42 = vmul.f32 1.442695, %v932_v41  ;;  %v562_v41 = vmax.f32 %v520_v40, 0.0 }
 0x733   : > { %1518 = vpow2.f32 %v935_v42 }
 0x736   : > { %v927_v43 = vpop.xlane.xlu0 %926 }
 0x737   : > { %v933_v44 = vsub.f32 %v919_v32, %v927_v43  ;;  %v522_v42 = vpop.f32.mrf.mxu1  ;;  %v558_v43 = vmax.f32 %v515_v36, 0.0 }
 0x739   : > { %v1519_v45 = vpop.eup %1518  ;;  %v937_v46 = vmul.f32 1.442695, %v933_v44  ;;  %v560_v44 = vmax.f32 %v517_v39, 0.0 }
 0x73a   : > { %v941_v50 = vsel %vm921_vm10, %v1519_v45, 0.0 }
 0x73b   : > { %1520 = vpow2.f32 %v937_v46  ;;  %942 = vadd.xlane.f32.xlu2 %v941_v50  ;;  %v582_v49 = vpack.c.bf16 %v560_v44, %v558_v43 }
 0x73e   : > { %v931_v51 = vpop.xlane.xlu2 %930 }
 0x73f   : > { %v934_v47 = vsub.f32 %v920_v35, %v931_v51 }
 0x741   : > { %v1521_v48 = vpop.eup %1520  ;;  %v939_v37 = vmul.f32 1.442695, %v934_v47 }
 0x742   : > { %v944_v52 = vsel %vm921_vm10, %v1521_v48, 0.0 }
 0x743   : > { %1522 = vpow2.f32 %v939_v37  ;;  %945 = vadd.xlane.f32.xlu2 %v944_v52 }
 0x749   : > { %v1841_v38 = vpop.eup %1522 }
 0x74a   : > { %v947_v53 = vsel %vm928_vm0, %v1841_v38, 0.0 }
 0x74b   : > { %948 = vadd.xlane.f32.xlu2 %v947_v53 }
 0x7ae   : > { %v943_v54 = vpop.xlane.xlu2 %942 }
 0x7af   : > { %1524 = vrcp.f32 %v943_v54  ;;  %v961_v60 = vand.u32 2147483648, %v943_v54  ;;  %v959_v62 = vand.u32 2147483647, %v943_v54  ;;  %vm955_vm6 = vweird.f32 %v943_v54 }
 0x7b1   : > { %v962_v3 = vor.u32 1.1754944e-38, %v961_v60  ;;  %vm960_vm12 = vcmp.eq.f32.partialorder %v959_v62, 8.507059e+37 }
 0x7b5   : > { %v1525_v56 = vpop.eup %1524 }
 0x7b6   : > { %v951_v57 = vmul.f32 %v1525_v56, %v943_v54  ;;  %v946_v58 = vpop.xlane.xlu2 %945  ;;  %vm956_vm2 = vweird.f32 %v1525_v56  ;;  %v590_v54 = vld [vmem:[%s1907_s3] sm:$0xff] }
 0x7b7   : > { %1526 = vrcp.f32 %v946_v58  ;;  %vm957_vm11 = vmor %vm955_vm6, %vm956_vm2  ;;  %v976_v11 = vand.u32 2147483648, %v946_v58  ;;  %v974_v13 = vand.u32 2147483647, %v946_v58  ;;  %vm970_vm14 = vweird.f32 %v946_v58 }
 0x7b8   : > { %v952_v59 = vsub.f32 1.0, %v951_v57 }
 0x7b9   : > { %v977_v17 = vor.u32 1.1754944e-38, %v976_v11  ;;  %vm975_vm1 = vcmp.eq.f32.partialorder %v974_v13, 8.507059e+37 }
 0x7ba   : > { %v953_v61 = vmul.f32 %v1525_v56, %v952_v59 }
 0x7bc   : > { %v954_v0 = vadd.f32 %v1525_v56, %v953_v61 }
 0x7bd   : > { %v1527_v1 = vpop.eup %1526 }
 0x7be   : > { %v958_v4 = vsel %vm957_vm11, %v1525_v56, %v954_v0  ;;  %v966_v5 = vmul.f32 %v1527_v1, %v946_v58  ;;  %v949_v7 = vpop.xlane.xlu2 %948  ;;  %vm971_vm13 = vweird.f32 %v1527_v1 }
 0x7bf   : > { %v963_v8 = vsel %vm960_vm12, %v962_v3, %v958_v4  ;;  %1528 = vrcp.f32 %v949_v7  ;;  %vm972_vm15 = vmor %vm970_vm14, %vm971_vm13  ;;  %v991_v21 = vand.u32 2147483648, %v949_v7  ;;  %v989_v24 = vand.u32 2147483647, %v949_v7 }
 0x7c0   : > { %v967_v9 = vsub.f32 1.0, %v966_v5  ;;  %v964_v10 = vmul.f32 %v1519_v45, %v963_v8  ;;  %vm985_vm4 = vweird.f32 %v949_v7  ;;  %v564_v45 = vmax.f32 %v522_v42, 0.0 }
 0x7c1   : > { %v992_v30 = vor.u32 1.1754944e-38, %v991_v21  ;;  %vm990_vm9 = vcmp.eq.f32.partialorder %v989_v24, 8.507059e+37 }
 0x7c2   : > { %v968_v12 = vmul.f32 %v1527_v1, %v967_v9  ;;  %1422 = vmatmul.msk.f32.vlgmr.msrb.gmra.mxu3 %vm921_vm10, %v964_v10  ;;  %v584_v46 = vpack.c.bf16 %v564_v45, %v562_v41  ;;  %v591_v45 = vld [vmem:[%s1908_s4] sm:$0xff] }
 0x7c4   : > { %v969_v15 = vadd.f32 %v1527_v1, %v968_v12  ;;  %1067 = vmatpush.bf16.msra.mxu3 %v584_v46 }
 0x7c5   : > { %v1529_v16 = vpop.eup %1528 }
 0x7c6   : > { %v981_v18 = vmul.f32 %v1529_v16, %v949_v7  ;;  %v973_v2 = vsel %vm972_vm15, %v1527_v1, %v969_v15  ;;  %vm986_vm7 = vweird.f32 %v1529_v16 }
 0x7c7   : > { %v978_v6 = vsel %vm975_vm1, %v977_v17, %v973_v2  ;;  %vm987_vm8 = vmor %vm985_vm4, %vm986_vm7 }
 0x7c8   : > { %v982_v19 = vsub.f32 1.0, %v981_v18  ;;  %v979_v20 = vmul.f32 %v1521_v48, %v978_v6  ;;  %1068 = vmatpush.bf16.msra.mxu3 %v582_v49  ;;  %v1614_v49 = vmov 0  }
 0x7c9   : > { %1504 = vset.pattern.permute.xlu2 %v1614_v49  ;;  %1505 = vset.pattern.permute.xlu0 %v1614_v49 }
 0x7ca   : > { %v983_v23 = vmul.f32 %v1529_v16, %v982_v19  ;;  %1423 = vmatmul.msk.f32.gmra.mxu3 %vm921_vm10, %v979_v20  ;;  %1181 = vperm.xlu2 %1504, %v591_v45  }
 0x7cc   : > { %v984_v29 = vadd.f32 %v1529_v16, %v983_v23 }
 0x7ce   : > { %v988_v32 = vsel %vm987_vm8, %v1529_v16, %v984_v29 }
 0x7cf   : > { %v993_v33 = vsel %vm990_vm9, %v992_v30, %v988_v32 }
 0x7d0   : > { %v994_v35 = vmul.f32 %v1841_v38, %v993_v33 }
 0x7d2   : > { %1424 = vmatmul.msk.f32.gmra.mxu3 %vm921_vm10, %v994_v35  ;;  %vm1079_vm10 = vcmask 1043456  }
 0x845   : > { %v1023_v50 = vpop.f32.mrf.mxu3 }
 0x846   : > { %v1032_v47 = vmul.f32 0.17677669, %v1023_v50 }
 0x84d   : > { %v1026_v51 = vpop.f32.mrf.mxu3 }
 0x84e   : > { %v1033_v48 = vmul.f32 0.17677669, %v1026_v51 }
 0x850   : > { %v1035_v37 = vpack.c.bf16 %v1033_v48, %v1032_v47 }
 0x852   : > { %1425 = vmatmul.msk.bf16.vlgmr.msra.gmra.mxu2 %vm665_vm3, %v1035_v37  ;;  %1427 = vmatmul.msk.bf16.vlgmr.msra.gmra.mxu3 %vm665_vm3, %v1035_v37 }
 0x855   : > { %v1029_v52 = vpop.f32.mrf.mxu3 }
 0x856   : > { %1429 = vmatpush.xpose.msk.msrb.mxu0 %vm665_vm3, %v1029_v52  ;;  %v1034_v38 = vmul.f32 0.17677669, %v1029_v52 }
 0x858   : > { %v1036_v53 = vpack.c.bf16 %v1034_v38, %v1034_v38 }
 0x85a   : > { %1430 = vmatpush.xpose.msk.msrb.mxu0 %vm665_vm3, %v1026_v51 }
 0x85e   : > { %1431 = vmatpush.xpose.msk.msrb.mxu0 %vm665_vm3, %v1023_v50 }
 0x861   : > { %1432 = vmatmul.msk.f32.vlgmr.msrb.gmra.mxu0 %vm665_vm3, %v590_v54 }
 0x862   : > { %1426 = vmatmul.msk.bf16.gmra.mxu2 %vm665_vm3, %v1036_v53  ;;  %1428 = vmatmul.msk.bf16.gmra.mxu3 %vm665_vm3, %v1036_v53  ;;  %vm1184_vm3 = vcmask 162816  }
 0x8d5   : > { %v1052_v55 = vpop.f32.mrf.mxu2  ;;  %v1070_v56 = vpop.f32.mrf.mxu3 }
 0x8dd   : > { %v1054_v57 = vpop.f32.mrf.mxu2  ;;  %v1072_v58 = vpop.f32.mrf.mxu3 }
 0x8e5   : > { %v1057_v59 = vpop.f32.mrf.mxu2  ;;  %v1075_v60 = vpop.f32.mrf.mxu3 }
 0x8e6   : > { %v1080_v61 = vsel %vm1079_vm10, %v1057_v59, -inf  ;;  %v1089_v62 = vsel %vm1079_vm10, %v1075_v60, -inf }
 0x8e7   : > { %v1081_v63 = vmax.f32 %v1052_v55, %v1080_v61  ;;  %v1090_v0 = vmax.f32 %v1070_v56, %v1089_v62 }
 0x8e9   : > { %v1082_v1 = vmax.f32 %v1081_v63, %v1054_v57  ;;  %v1091_v3 = vmax.f32 %v1090_v0, %v1072_v58  ;;  %v1171_v0 = vpop.f32.mrf.mxu0 }
 0x8eb   : > { %v1083_v4 = vrot.slane %v1082_v1, 4  ;;  %v1092_v5 = vrot.slane %v1091_v3, 4 }
 0x8ed   : > { %v1084_v7 = vmax.f32 %v1082_v1, %v1083_v4  ;;  %v1093_v8 = vmax.f32 %v1091_v3, %v1092_v5  ;;  %v1059_v9 = vpop.f32.mrf.mxu2  ;;  %v1077_v10 = vpop.f32.mrf.mxu3 }
 0x8ee   : > { %v1182_v9 = vpop.permute.xlu2 %1181 }
 0x8ef   : > { %v1085_v11 = vrot.slane %v1084_v7, 2  ;;  %v1094_v12 = vrot.slane %v1093_v8, 2 }
 0x8f1   : > { %v1086_v13 = vmax.f32 %v1084_v7, %v1085_v11  ;;  %v1095_v14 = vmax.f32 %v1093_v8, %v1094_v12  ;;  %v1174_v7 = vpack.c.bf16 %v1171_v0, %v1171_v0 }
 0x8f3   : > { %v1087_v15 = vrot.slane %v1086_v13, 1  ;;  %v1096_v16 = vrot.slane %v1095_v14, 1 }
 0x8f5   : > { %v1088_v17 = vmax.f32 %v1086_v13, %v1087_v15  ;;  %v1097_v18 = vmax.f32 %v1095_v14, %v1096_v16 }
 0x8f7   : > { %v1098_v2 = vsub.f32 %v1052_v55, %v1088_v17  ;;  %v1100_v6 = vsub.f32 %v1054_v57, %v1088_v17  ;;  %v1102_v19 = vsub.f32 %v1057_v59, %v1088_v17  ;;  %v1099_v20 = vsub.f32 %v1070_v56, %v1097_v18 }
 0x8f8   : > { %v1101_v21 = vsub.f32 %v1072_v58, %v1097_v18  ;;  %v1103_v22 = vsub.f32 %v1075_v60, %v1097_v18 }
 0x8f9   : > { %v1104_v23 = vmul.f32 1.442695, %v1098_v2  ;;  %v1108_v24 = vmul.f32 1.442695, %v1100_v6  ;;  %v1112_v25 = vmul.f32 1.442695, %v1102_v19 }
 0x8fa   : > { %v1106_v26 = vmul.f32 1.442695, %v1099_v20  ;;  %v1110_v27 = vmul.f32 1.442695, %v1101_v21  ;;  %v1114_v28 = vmul.f32 1.442695, %v1103_v22 }
 0x8fb   : > { %1530 = vpow2.f32 %v1104_v23 }
 0x8fc   : > { %1532 = vpow2.f32 %v1108_v24 }
 0x8fd   : > { %1534 = vpow2.f32 %v1112_v25 }
 0x8fe   : > { %1536 = vpow2.f32 %v1106_v26 }
 0x8ff   : > { %1538 = vpow2.f32 %v1110_v27 }
 0x900   : > { %1540 = vpow2.f32 %v1114_v28 }
 0x901   : > { %v1531_v29 = vpop.eup %1530 }
 0x902   : > { %v1533_v30 = vpop.eup %1532 }
 0x903   : > { %v1535_v31 = vpop.eup %1534  ;;  %v1116_v32 = vadd.f32 %v1533_v30, %v1531_v29 }
 0x904   : > { %v1537_v33 = vpop.eup %1536  ;;  %v1117_v34 = vsel %vm1079_vm10, %v1535_v31, 0.0 }
 0x905   : > { %v1539_v35 = vpop.eup %1538  ;;  %v1118_v36 = vadd.f32 %v1117_v34, %v1116_v32 }
 0x906   : > { %v1541_v39 = vpop.eup %1540  ;;  %v1125_v40 = vadd.f32 %v1539_v35, %v1537_v33 }
 0x907   : > { %v1119_v41 = vrot.slane %v1118_v36, 4  ;;  %v1126_v42 = vsel %vm1079_vm10, %v1541_v39, 0.0 }
 0x908   : > { %v1127_v43 = vadd.f32 %v1126_v42, %v1125_v40 }
 0x909   : > { %v1120_v44 = vadd.f32 %v1119_v41, %v1118_v36 }
 0x90a   : > { %v1128_v46 = vrot.slane %v1127_v43, 4 }
 0x90b   : > { %v1121_v50 = vrot.slane %v1120_v44, 2 }
 0x90c   : > { %v1129_v51 = vadd.f32 %v1128_v46, %v1127_v43 }
 0x90d   : > { %v1122_v47 = vadd.f32 %v1121_v50, %v1120_v44 }
 0x90e   : > { %v1130_v48 = vrot.slane %v1129_v51, 2 }
 0x90f   : > { %v1123_v37 = vrot.slane %v1122_v47, 1 }
 0x910   : > { %v1131_v52 = vadd.f32 %v1130_v48, %v1129_v51 }
 0x911   : > { %v1124_v38 = vadd.f32 %v1123_v37, %v1122_v47 }
 0x912   : > { %v1132_v53 = vrot.slane %v1131_v52, 1 }
 0x913   : > { %1542 = vrcp.f32 %v1124_v38 }
 0x914   : > { %v1133_v54 = vadd.f32 %v1132_v53, %v1131_v52 }
 0x916   : > { %1544 = vrcp.f32 %v1133_v54 }
 0x919   : > { %v1543_v55 = vpop.eup %1542 }
 0x91a   : > { %v1140_v56 = vmul.f32 %v1543_v55, %v1535_v31  ;;  %v1136_v60 = vmul.f32 %v1543_v55, %v1531_v29  ;;  %v1138_v61 = vmul.f32 %v1543_v55, %v1533_v30 }
 0x91c   : > { %v1545_v57 = vpop.eup %1544  ;;  %v1177_v58 = vpack.c.bf16 %v1140_v56, %v1140_v56  ;;  %v1175_v5 = vpack.c.bf16 %v1138_v61, %v1136_v60 }
 0x91d   : > { %v1141_v59 = vmul.f32 %v1545_v57, %v1541_v39  ;;  %v1137_v1 = vmul.f32 %v1545_v57, %v1537_v33  ;;  %v1139_v3 = vmul.f32 %v1545_v57, %v1539_v35 }
 0x91e   : > { %v1189_v62 = vsel %vm758_vm5, %v1177_v58, 0 }
 0x91f   : > { %1200 = vmatpush.bf16.msrb.mxu1 %v1189_v62  ;;  %v1178_v63 = vpack.c.bf16 %v1141_v59, %v1141_v59  ;;  %v1176_v8 = vpack.c.bf16 %v1139_v3, %v1137_v1 }
 0x921   : > { %v1192_v4 = vsel %vm758_vm5, %v1178_v63, 0 }
 0x922   : > { %1213 = vmatpush.bf16.msra.mxu0 %v1192_v4 }
 0x923   : > { %1201 = vmatpush.bf16.msrb.mxu1 %v1175_v5 }
 0x926   : > { %1214 = vmatpush.bf16.msra.mxu0 %v1176_v8  ;;  %1433 = vmatmul.msk.bf16.vlgmr.msrb.gmra.mxu1 %vm1184_vm3, %v1174_v7 }
 0x929   : > { %1434 = vmatmul.msk.bf16.vlgmr.msra.gmra.mxu0 %vm1184_vm3, %v1174_v7 }
 0x9a3   : > { %v1203_v10 = vpop.f32.mrf.mxu1 }
 0x9a4   : > { %v1204_v11 = vadd.f32 %v1203_v10, %v1182_v9 }
 0x9a6   : > { %v1216_v12 = vpop.f32.mrf.mxu0  ;;  %1220 = vst [vmem:[%s270_s26] sm:$0xff] %v1204_v11 }
 0x9a7   : > { %v1217_v13 = vadd.f32 %v1216_v12, %v1182_v9 }
 0x9a9   : > { %1221 = vst [vmem:[%s270_s26 + $0x8] sm:$0xff] %v1217_v13 }
 0x9aa   : > { %1573 = shalt.err (!%p1570_p5)
}
 0x9ab   : > { %1460 = dma.vmem_to_hbm [thread:$0]  (%p1683_p6), %s1237_s30, 256, %s1239_s6, %s1223_s7   ;;  %v1205_v14 = vpop.f32.mrf.mxu1 }
 0x9ae   : > { %v1218_v15 = vpop.f32.mrf.mxu0 }
 0x9af PF: > { %s1250_s12 = sand.u32 1, %s1596_s18   ;;  %p1463_p7 = pnand %p1306_p9, %p1687_p8 }
 0x9b0   : > { %s1251_s15 = scalar_lea.sflag [#allocation4], %s1250_s12 }
 0x9b1   : > { %p1464_p10 = pneg %p1463_p7 }
 0x9b3   : > { %1591 = dma.done.wait (%p1464_p10), %s1251_s15, 256  }
 0x9b4   : > { %1593 = vsyncadd (%p1464_p10), %s1251_s15, 4294967040  ;;  %p15_p6 = scmp.ge.s32.totalorder %s1668_s24, 4   ;;  %s1912_s18 = smov %s1600_s19 }
 0x9b5   : > { %s1913_s19 = smov %s1604_s20  ;;  %s1914_s20 = smov %s1681_s27 }
 0x9b6   : > { %s1915_s21 = smov %s1668_s24  ;;  %17 = sbr.rel (!%p15_p6) target bundleno = 3 (0x3), region = 118 }
 0x9bb   :  { %1257 = vsyncpa [#allocation4], 1 }
 0x9bc   :  { %1259 = vsyncpa [#allocation4 + $0x1], 1 }

</bundles_post_ra>
